<compile_context>
chip_gen: v5e
topology: v5e:2x2
jax: 0.10.0
libtpu: 0.0.40
codegen_flags: <defaults>
</compile_context>

<pallas_src>
import jax
import jax.numpy as jnp
from jax.experimental import pallas as pl
from jax.experimental.pallas import tpu as pltpu

_LANE = 128
_VMEM_BUDGET = 10 << 20     # target for double-buffered per-step footprint (v5e-safe)
_MAX_LANES = 32768          # big tiles are the main lever for this streaming kernel


def _tuple_transform_kernel(x_ref, mean_ref, inv_std_ref, gray_w_ref,
                            norm_ref, gray_ref, tone_ref):
    """One grid step = B_N images x one lane-dense spatial tile.

    x_ref       : (B_N, C, T) input dtype, VMEM
    mean_ref    : (1, C, 1) f32, VMEM (constant block, stays resident)
    inv_std_ref : (1, C, 1) f32
    gray_w_ref  : (1, C, 1) f32
    norm_ref    : (B_N, C, T),  gray_ref : (B_N, T),  tone_ref : (B_N, C, T)
    """
    x = x_ref[...].astype(jnp.float32)            # single read pass; cast is free on VPU

    # 1) Normalize: one full-block expression, one whole-block store.
    norm_ref[...] = ((x - mean_ref[...]) * inv_std_ref[...]).astype(norm_ref.dtype)

    # 2) Grayscale: cross-sublane reduce over C goes to the (otherwise idle) XLU.
    gray_ref[...] = jnp.sum(x * gray_w_ref[...], axis=1).astype(gray_ref.dtype)

    # 3) Smoothstep tonemap of the clipped input.
    xc = jnp.clip(x, 0.0, 1.0)
    tone_ref[...] = (xc * xc * (3.0 - 2.0 * xc)).astype(tone_ref.dtype)


def _round_up(x, m):
    return ((x + m - 1) // m) * m


def _choose_batch_block(n, c, itemsize):
    """Images per block; returns (b_n, n_padded)."""
    if n <= 8:
        return n, n                                # full-dim escape hatch
    if n % 8 == 0:
        return 8, n                                # sublane-dense grayscale tiles
    # Unaligned N > 8: keep the full batch in one block if even the minimal
    # (T=128) footprint fits; otherwise pad N up to a multiple of 8.
    if 2 * n * (3 * c + 1) * _LANE * itemsize <= _VMEM_BUDGET:
        return n, n
    return 8, _round_up(n, 8)


def _choose_spatial_tile(hw_p, b_n, c, itemsize, max_lanes=_MAX_LANES):
    """Largest multiple of 128 dividing hw_p whose double-buffered per-step
    footprint (input + 3 outputs) stays under the VMEM budget."""
    t_cap = _VMEM_BUDGET // (2 * b_n * (3 * c + 1) * itemsize)
    t_cap = min(t_cap, max_lanes, hw_p)
    t = max(_LANE, (t_cap // _LANE) * _LANE)
    while hw_p % t != 0:
        t -= _LANE
    return t


def tuple_transform(img, mean, std, gray_w):
    """Apply the three fused transforms to `img` and return them as a tuple.

    img    : (N, C, H, W), any real dtype
    mean   : (C,)   std : (C,)   gray_w : (C,)
    """
    N, C, H, W = img.shape
    HW = H * W
    out_dtype = img.dtype if jnp.issubdtype(img.dtype, jnp.floating) else jnp.float32
    itemsize = 4                                   # f32 compute / output upper bound

    B_N, N_p = _choose_batch_block(N, C, itemsize)
    HW_p = _round_up(HW, _LANE)
    T = _choose_spatial_tile(HW_p, B_N, C, itemsize)

    # v7x megacore: keep >= 2 grid steps when the workload allows it.
    if (N_p // B_N) * (HW_p // T) < 2 and HW_p >= 2 * _LANE:
        T = _choose_spatial_tile(HW_p, B_N, C, itemsize, max_lanes=HW_p // 2)

    # Wrapper-side layout plumbing only: flatten H*W (no dtype cast!) and pad
    # to lane/batch block multiples only when needed.
    x = img.reshape(N, C, HW)
    if N_p != N or HW_p != HW:
        x = jnp.pad(x, ((0, N_p - N), (0, 0), (0, HW_p - HW)))

    f32 = jnp.float32
    mean_b = jnp.asarray(mean, f32).reshape(1, C, 1)
    inv_std_b = (1.0 / jnp.asarray(std, f32)).reshape(1, C, 1)
    gray_w_b = jnp.asarray(gray_w, f32).reshape(1, C, 1)

    grid = (N_p // B_N, HW_p // T)

    param_spec = pl.BlockSpec((1, C, 1), lambda b, t: (0, 0, 0))
    in_specs = [
        pl.BlockSpec((B_N, C, T), lambda b, t: (b, 0, t)),   # image
        param_spec, param_spec, param_spec,                  # mean, 1/std, gray_w
    ]
    out_specs = (
        pl.BlockSpec((B_N, C, T), lambda b, t: (b, 0, t)),   # normalize
        pl.BlockSpec((B_N, T), lambda b, t: (b, t)),         # grayscale (2-D)
        pl.BlockSpec((B_N, C, T), lambda b, t: (b, 0, t)),   # tonemap
    )
    out_shapes = (
        jax.ShapeDtypeStruct((N_p, C, HW_p), out_dtype),
        jax.ShapeDtypeStruct((N_p, HW_p), out_dtype),
        jax.ShapeDtypeStruct((N_p, C, HW_p), out_dtype),
    )

    out_itemsize = jnp.dtype(out_dtype).itemsize
    cost = pl.CostEstimate(
        flops=9 * N_p * C * HW_p,
        transcendentals=0,
        bytes_accessed=(x.size * x.dtype.itemsize
                        + 3 * C * 4
                        + (2 * C + 1) * N_p * HW_p * out_itemsize),
    )

    norm, gray, tone = pl.pallas_call(
        _tuple_transform_kernel,
        out_shape=out_shapes,
        grid=grid,
        in_specs=in_specs,
        out_specs=out_specs,
        compiler_params=pltpu.CompilerParams(
            dimension_semantics=("parallel", "parallel")),
        cost_estimate=cost,
    )(x, mean_b, inv_std_b, gray_w_b)

    # Undo padding and restore the module's output shapes.
    if N_p != N or HW_p != HW:
        norm = norm[:N, :, :HW]
        gray = gray[:N, :HW]
        tone = tone[:N, :, :HW]
    return (norm.reshape(N, C, H, W),
            gray.reshape(N, 1, H, W),
            tone.reshape(N, C, H, W))


if __name__ == "__main__":
    key = jax.random.PRNGKey(0)
    N, C, H, W = 2, 4, 16, 16
    img = jax.random.uniform(key, (N, C, H, W), dtype=jnp.float32,
                             minval=-0.25, maxval=1.25)

    # Deterministic "parameters" of the constituent transforms.
    mean = jnp.linspace(0.1, 0.4, C, dtype=jnp.float32)
    std = jnp.linspace(0.5, 0.8, C, dtype=jnp.float32)
    gray_w = jnp.array([0.1, 0.2, 0.3, 0.4], dtype=jnp.float32)

    outs = jax.block_until_ready(tuple_transform(img, mean, std, gray_w))

    # Reference check (plain JAX) for the tuple semantics.
    ref_norm = (img - mean.reshape(1, C, 1, 1)) / std.reshape(1, C, 1, 1)
    ref_gray = jnp.sum(img * gray_w.reshape(1, C, 1, 1), axis=1, keepdims=True)
    xc = jnp.clip(img, 0.0, 1.0)
    ref_tone = xc * xc * (3.0 - 2.0 * xc)

    assert isinstance(outs, tuple) and len(outs) == 3
    assert outs[0].shape == (N, C, H, W)
    assert outs[1].shape == (N, 1, H, W)
    assert outs[2].shape == (N, C, H, W)
    assert jnp.allclose(outs[0], ref_norm, atol=1e-5)
    assert jnp.allclose(outs[1], ref_gray, atol=1e-5)
    assert jnp.allclose(outs[2], ref_tone, atol=1e-5)

    print("KERNEL_OK")
</pallas_src>

<mosaic_0001>
module attributes {stable_mosaic.version = 11 : i64} {
  func.func @_tuple_transform_kernel(%arg0: i32, %arg1: i32, %arg2: memref<2x4x128xf32, #tpu.memory_space<vmem>>, %arg3: memref<1x4x1xf32, #tpu.memory_space<vmem>>, %arg4: memref<1x4x1xf32, #tpu.memory_space<vmem>>, %arg5: memref<1x4x1xf32, #tpu.memory_space<vmem>>, %arg6: memref<2x4x128xf32, #tpu.memory_space<vmem>>, %arg7: memref<2x128xf32, #tpu.memory_space<vmem>>, %arg8: memref<2x4x128xf32, #tpu.memory_space<vmem>>) attributes {dimension_semantics = [#tpu.dimension_semantics<parallel>, #tpu.dimension_semantics<parallel>], iteration_bounds = array<i64: 1, 2>, scalar_prefetch = 0 : i64, scratch_operands = 0 : i64, tpu.core_type = #tpu.core_type<tc>, window_params = [{transform_indices = @transform_0, window_bounds = array<i64: 2, 4, 128>}, {pipeline_mode = #tpu.pipeline_mode<synchronous>, transform_indices = @transform_1, window_bounds = array<i64: 1, 4, 1>}, {pipeline_mode = #tpu.pipeline_mode<synchronous>, transform_indices = @transform_2, window_bounds = array<i64: 1, 4, 1>}, {pipeline_mode = #tpu.pipeline_mode<synchronous>, transform_indices = @transform_3, window_bounds = array<i64: 1, 4, 1>}, {transform_indices = @transform_4, window_bounds = array<i64: 2, 4, 128>}, {transform_indices = @transform_5, window_bounds = array<i64: 2, 128>}, {transform_indices = @transform_6, window_bounds = array<i64: 2, 4, 128>}]} {
    %c0 = arith.constant 0 : index
    %c0_0 = arith.constant 0 : index
    %c0_1 = arith.constant 0 : index
    %0 = vector.load %arg2[%c0, %c0_0, %c0_1] : memref<2x4x128xf32, #tpu.memory_space<vmem>>, vector<2x4x128xf32>
    %c0_2 = arith.constant 0 : index
    %c0_3 = arith.constant 0 : index
    %c0_4 = arith.constant 0 : index
    %1 = vector.load %arg3[%c0_2, %c0_3, %c0_4] : memref<1x4x1xf32, #tpu.memory_space<vmem>>, vector<1x4x1xf32>
    %2 = vector.broadcast %1 : vector<1x4x1xf32> to vector<2x4x128xf32>
    %3 = arith.subf %0, %2 : vector<2x4x128xf32>
    %c0_5 = arith.constant 0 : index
    %c0_6 = arith.constant 0 : index
    %c0_7 = arith.constant 0 : index
    %4 = vector.load %arg4[%c0_5, %c0_6, %c0_7] : memref<1x4x1xf32, #tpu.memory_space<vmem>>, vector<1x4x1xf32>
    %5 = vector.broadcast %4 : vector<1x4x1xf32> to vector<2x4x128xf32>
    %6 = arith.mulf %3, %5 : vector<2x4x128xf32>
    %c0_8 = arith.constant 0 : index
    %c0_9 = arith.constant 0 : index
    %c0_10 = arith.constant 0 : index
    %7 = vector.load %arg6[%c0_8, %c0_9, %c0_10] : memref<2x4x128xf32, #tpu.memory_space<vmem>>, vector<2x4x128xf32>
    tpu.vector_store %arg6[%c0_8, %c0_9, %c0_10], %6 {strides = array<i32>} : memref<2x4x128xf32, #tpu.memory_space<vmem>>, vector<2x4x128xf32>,
    %c0_11 = arith.constant 0 : index
    %c0_12 = arith.constant 0 : index
    %c0_13 = arith.constant 0 : index
    %8 = vector.load %arg5[%c0_11, %c0_12, %c0_13] : memref<1x4x1xf32, #tpu.memory_space<vmem>>, vector<1x4x1xf32>
    %9 = vector.broadcast %8 : vector<1x4x1xf32> to vector<2x4x128xf32>
    %10 = arith.mulf %0, %9 : vector<2x4x128xf32>
    %cst = arith.constant dense<0.000000e+00> : vector<2x128xf32>
    %11 = vector.multi_reduction <add>, %10, %cst [1] : vector<2x4x128xf32> to vector<2x128xf32>
    %c0_14 = arith.constant 0 : index
    %c0_15 = arith.constant 0 : index
    %12 = vector.load %arg7[%c0_14, %c0_15] : memref<2x128xf32, #tpu.memory_space<vmem>>, vector<2x128xf32>
    tpu.vector_store %arg7[%c0_14, %c0_15], %11 {strides = array<i32>} : memref<2x128xf32, #tpu.memory_space<vmem>>, vector<2x128xf32>,
    %cst_16 = arith.constant 0.000000e+00 : f32
    %cst_17 = arith.constant 1.000000e+00 : f32
    %13 = vector.broadcast %cst_16 : f32 to vector<2x4x128xf32>
    %14 = arith.maximumf %13, %0 : vector<2x4x128xf32>
    %15 = vector.broadcast %cst_17 : f32 to vector<2x4x128xf32>
    %16 = arith.minimumf %15, %14 : vector<2x4x128xf32>
    %17 = arith.mulf %16, %16 : vector<2x4x128xf32>
    %cst_18 = arith.constant 2.000000e+00 : f32
    %18 = vector.broadcast %cst_18 : f32 to vector<2x4x128xf32>
    %19 = arith.mulf %18, %16 : vector<2x4x128xf32>
    %cst_19 = arith.constant 3.000000e+00 : f32
    %20 = vector.broadcast %cst_19 : f32 to vector<2x4x128xf32>
    %21 = arith.subf %20, %19 : vector<2x4x128xf32>
    %22 = arith.mulf %17, %21 : vector<2x4x128xf32>
    %c0_20 = arith.constant 0 : index
    %c0_21 = arith.constant 0 : index
    %c0_22 = arith.constant 0 : index
    %23 = vector.load %arg8[%c0_20, %c0_21, %c0_22] : memref<2x4x128xf32, #tpu.memory_space<vmem>>, vector<2x4x128xf32>
    tpu.vector_store %arg8[%c0_20, %c0_21, %c0_22], %22 {strides = array<i32>} : memref<2x4x128xf32, #tpu.memory_space<vmem>>, vector<2x4x128xf32>,
    return
  }
  func.func @transform_0(%arg0: i32, %arg1: i32) -> (i32, i32, i32) {
    %c0_i32 = arith.constant 0 : i32
    %c0_i32_0 = arith.constant 0 : i32
    return %arg0, %c0_i32, %arg1 : i32, i32, i32
  }
  func.func @transform_1(%arg0: i32, %arg1: i32) -> (i32, i32, i32) {
    %c0_i32 = arith.constant 0 : i32
    %c0_i32_0 = arith.constant 0 : i32
    %c0_i32_1 = arith.constant 0 : i32
    %c0_i32_2 = arith.constant 0 : i32
    return %c0_i32, %c0_i32_0, %c0_i32_1 : i32, i32, i32
  }
  func.func @transform_2(%arg0: i32, %arg1: i32) -> (i32, i32, i32) {
    %c0_i32 = arith.constant 0 : i32
    %c0_i32_0 = arith.constant 0 : i32
    %c0_i32_1 = arith.constant 0 : i32
    %c0_i32_2 = arith.constant 0 : i32
    return %c0_i32, %c0_i32_0, %c0_i32_1 : i32, i32, i32
  }
  func.func @transform_3(%arg0: i32, %arg1: i32) -> (i32, i32, i32) {
    %c0_i32 = arith.constant 0 : i32
    %c0_i32_0 = arith.constant 0 : i32
    %c0_i32_1 = arith.constant 0 : i32
    %c0_i32_2 = arith.constant 0 : i32
    return %c0_i32, %c0_i32_0, %c0_i32_1 : i32, i32, i32
  }
  func.func @transform_4(%arg0: i32, %arg1: i32) -> (i32, i32, i32) {
    %c0_i32 = arith.constant 0 : i32
    %c0_i32_0 = arith.constant 0 : i32
    return %arg0, %c0_i32, %arg1 : i32, i32, i32
  }
  func.func @transform_5(%arg0: i32, %arg1: i32) -> (i32, i32) {
    %c0_i32 = arith.constant 0 : i32
    return %arg0, %arg1 : i32, i32
  }
  func.func @transform_6(%arg0: i32, %arg1: i32) -> (i32, i32, i32) {
    %c0_i32 = arith.constant 0 : i32
    %c0_i32_0 = arith.constant 0 : i32
    return %arg0, %c0_i32, %arg1 : i32, i32, i32
  }
}

</mosaic_0001>

<bundles_post_ra>
// kernel: tpu_custom_call.1
= control target key start
LH: loop header
LB: loop body
LE: loop exit
PB: predicated region body
PF: predicated region fallthrough
CT: control target
= control target key end

     0   :  { %s1136_s0 = inlined_call_operand.hbm [shape: f32[2,4,256], index: 0, kind: input, shape index: {}]   ;;  %s1137_s1 = inlined_call_operand.vmem [shape: f32[1,4,1], index: 1, kind: input, shape index: {}]   ;;  %s1138_s2 = inlined_call_operand.vmem [shape: f32[1,4,1], index: 2, kind: input, shape index: {}]   ;;  %s1139_s3 = inlined_call_operand.vmem [shape: f32[1,4,1], index: 3, kind: input, shape index: {}]   ;;  %s1140_s4 = inlined_call_operand.hbm [shape: f32[2,4,256], index: 4, kind: output, shape index: {0}]   ;;  %s1141_s5 = inlined_call_operand.hbm [shape: f32[2,256], index: 5, kind: output, shape index: {1}]   ;;  %s1142_s6 = inlined_call_operand.hbm [shape: f32[2,4,256], index: 6, kind: output, shape index: {2}]  }
   0x1   :  { %1145 = sst [smem:[#allocation14_spill]] %s1136_s0 }
   0x2   :  { %12 = vsyncpa [#allocation3], 0 }
   0x3   :  { %14 = vsyncpa [#allocation3 + $0x1], 0 }
   0x4   :  { %15 = vsyncpa [#allocation4], 0 }
   0x5   :  { %17 = vsyncpa [#allocation4 + $0x1], 0 }
   0x6   :  { %18 = vsyncpa [#allocation7], 0 }
   0x7   :  { %20 = vsyncpa [#allocation7 + $0x1], 0  ;;  %s909_s21 = smov 0   ;;  %s911_s22 = smov 0  }
   0x8   :  { %s913_s23 = smov 0   ;;  %s915_s24 = smov 0  }
   0x9   :  { %s917_s25 = smov 0   ;;  %s919_s26 = smov 0  }
   0xa LB: > { %s940_s27 = sadd.s32 4294967295, %s865_s26   ;;  %s1143_s28 = sadd.s32 4294967294, %s865_s26   ;;  %s865_s26 = sphi %s919_s26, %s26_s26   ;;  %s861_s25 = sphi %s917_s25, %s1162_s25   ;;  %s857_s24 = sphi %s915_s24, %s1161_s24   ;;  %s853_s23 = sphi %s913_s23, %s1160_s23   ;;  %s849_s22 = sphi %s911_s22, %s1159_s22   ;;  %s845_s21 = sphi %s909_s21, %s1158_s21  }
   0xb   : > { %s35_s29 = sadd.s32 1, %s861_s25  ;;  %s47_s30 = sadd.s32 1, %s853_s23 }
   0xc   : > { %p36_p0 = scmp.ge.s32.totalorder %s35_s29, 2  ;;  %p54_p1 = scmp.ne.s32.totalorder %s853_s23, %s849_s22 }
   0xd   : > { %p55_p2 = scmp.eq.s32.totalorder %s865_s26, 0  ;;  %p60_p3 = scmp.ne.s32.totalorder %s849_s22, %s845_s21 }
   0xe   : > { %s1164_s29 = smov (%p36_p0, %s35_s29), 0  ;;  %p61_p5 = scmp.eq.s32.totalorder %s940_s27, 0 }
   0xf   : > { %1146 = sst [smem:[#allocation12_spill]] %s1164_s29  ;;  %p952_p4 = por %p55_p2, %p54_p1 }
  0x10   : > { %s43_s8 = ssub.s32 %s861_s25, %s1164_s29  ;;  %p149_p6 = scmp.eq.s32.totalorder %s940_s27, 1 }
  0x11   : > { %p45_p7 = scmp.eq.s32.totalorder %s43_s8, 0  ;;  %p960_p8 = por %p61_p5, %p60_p3 }
  0x12   : > { %p964_p9 = por %p149_p6, %p54_p1  ;;  %p155_p10 = scmp.eq.s32.totalorder %s1143_s28, 1 }
  0x13   : > { %s971_s11 = scalar_select %p45_p7, %s853_s23, %s47_s30  }
  0x14   : > { %p973_p11 = por %p155_p10, %p60_p3  ;;  %p596_p12 = scmp.ge.s32.totalorder %s865_s26, 2 }
  0x15   : > { %1150 = sst [smem:[#allocation13_spill]] %s971_s11  ;;  %p634_p13 = scmp.lt.s32.totalorder %s865_s26, 2 }
  0x16   : > { %s240_s13 = sand.u32 1, %s853_s23   ;;  %s598_s15 = sshll.u32 %s861_s25, 2 }
  0x17   : > { %s597_s14 = sshll.u32 %s240_s13, 3  ;;  %s1152_s0 = sld [smem:[#allocation14_spill]] }
  0x18   : > { %s244_s19 = scalar_lea.vmem [#allocation2], %s597_s14  ;;  %p621_p0 = pnand %p634_p13, %p952_p4 }
  0x19   : > { %s254_s20 = sshll.u32 %s244_s19, 4  ;;  %s241_s30 = scalar_lea.sflag [#allocation3], %s240_s13  ;;  %s255_s20 = int_to_ptr.vmem [resolvable:$true] %s254_s20 }
  0x1a   : > { %s867_s28 = smov 128   ;;  %s868_s29 = smov 64  }
  0x1b   : > { %s869_s11 = smov 4   ;;  %p599_p1 = scmp.ge.s32.totalorder %s865_s26, 1 }
  0x1c   : > { %p262_p2 = scmp.lt.s32.totalorder %s865_s26, 3 }
  0x1d   : > { %s251_s18 = scalar_lea.hbm %s1152_s0, %s598_s15 }
  0x1e   : > { %s252_s8 = sshll.u32 %s251_s18, 4  ;;  %p263_p3 = pnand %p599_p1, %p262_p2  ;;  %s253_s8 = int_to_ptr.hbm [resolvable:$true] %s252_s8 }
  0x1f   : > { %623 = dma.hbm_to_vmem [thread:$0]  (!%p621_p0), %s253_s8, 128, %s255_s20, %s241_s30, %s867_s28, %s868_s29, %s869_s11  }
  0x20   : > { %266 = sbr.rel (%p263_p3) target bundleno = 197 (0xc5), region = 36  ;;  %s989_s16 = sand.u32 (!%p263_p3), 1, %s849_s22  }
  0x21   : > { %s992_s14 = sshll.u32 (!%p263_p3), %s989_s16, 3  ;;  %s269_s7 = scalar_lea.sflag (!%p263_p3), [#allocation3], %s989_s16 }
  0x22   : > { %s272_s15 = scalar_lea.vmem (!%p263_p3), [#allocation2], %s992_s14 }
  0x25   : > { %832 = dma.done.wait (%p960_p8), %s269_s7, 128  }
  0x26   : > { %834 = vsyncadd (%p960_p8), %s269_s7, 4294967168  ;;  %v870_v0 = vmov 0   ;;  %v335_v1 = vld [vmem:[%s1139_s3] sm:$0xf]  ;;  %v316_v5 = vld [vmem:[%s272_s15 + $0x4] sm:$0xf] }
  0x27   : > { %691 = vset.pattern.permute.xlu0 %v870_v0  ;;  %692 = vset.pattern.permute.xlu1 %v870_v0  ;;  %v325_v2 = vld [vmem:[%s1138_s2] sm:$0xf]  ;;  %v365_v7 = vmax.f32 %v316_v5, 0.0  ;;  %s1010_s9 = scalar_lea.vmem [#allocation8], %s992_s14  ;;  %vm343_vm0 = vcmask 1043456   ;;  %s602_s19 = sshll.u32 %s989_s16, 1 }
  0x28   : > { %338 = vperm.xlu0 %691, %v335_v1   ;;  %328 = vperm.xlu1 %692, %v325_v2   ;;  %v317_v3 = vld [vmem:[%s1137_s1] sm:$0xf]  ;;  %s608_s20 = sshll.u32 %s857_s24, 1  ;;  %s607_s8 = sshll.u32 %s857_s24, 2  ;;  %vm360_vm1 = vcmask 1041409  }
  0x29   : > { %v315_v4 = vld [vmem:[%s272_s15] sm:$0xf]  ;;  %v367_v9 = vmin.f32 %v365_v7, 1.0  ;;  %s1018_s30 = scalar_lea.vmem [#allocation5], %s992_s14  ;;  %s1024_s29 = scalar_lea.hbm %s1141_s5, %s608_s20 }
  0x2a   : > { %v364_v6 = vmax.f32 %v315_v4, 0.0  ;;  %s403_s7 = sshll.u32 %s1018_s30, 4  ;;  %s402_s17 = scalar_lea.hbm %s1140_s4, %s607_s8  ;;  %s1030_s7 = int_to_ptr.vmem [resolvable:$true] %s403_s7 }
  0x2b   : > { %v371_v11 = vmul.f32 2.0, %v367_v9  ;;  %v369_v13 = vmul.f32 %v367_v9, %v367_v9  ;;  %s1033_s14 = scalar_lea.vmem [#allocation6], %s602_s19  ;;  %s424_s20 = sshll.u32 %s1024_s29, 4  ;;  %s1049_s20 = int_to_ptr.hbm [resolvable:$true] %s424_s20 }
  0x2c   : > { %v366_v8 = vmin.f32 %v364_v6, 1.0  ;;  %s422_s15 = sshll.u32 %s1033_s14, 4  ;;  %s405_s28 = sshll.u32 %s402_s17, 4  ;;  %s1042_s28 = int_to_ptr.hbm [resolvable:$true] %s405_s28  ;;  %s1047_s15 = int_to_ptr.vmem [resolvable:$true] %s422_s15 }
  0x2d   : > { %v373_v15 = vsub.f32 3.0, %v371_v11  ;;  %s1040_s18 = scalar_lea.hbm %s1142_s6, %s607_s8  ;;  %s379_s8 = scalar_lea.sflag [#allocation4], %s989_s16 }
  0x2e   : > { %v370_v10 = vmul.f32 2.0, %v366_v8  ;;  %v368_v12 = vmul.f32 %v366_v8, %v366_v8  ;;  %s440_s19 = sshll.u32 %s1040_s18, 4  ;;  %s737_s29 = sshra.s32 %s1042_s28, 4  ;;  %s738_s29 = int_to_ptr.hbm [resolvable:$true] %s737_s29  ;;  %s1073_s19 = int_to_ptr.hbm [resolvable:$true] %s440_s19 }
  0x2f   : > { %v375_v17 = vmul.f32 %v373_v15, %v369_v13  ;;  %s739_s17 = scalar_lea.hbm %s738_s29, 8  ;;  %s743_s24 = scalar_lea.hbm %s1140_s4, 16 }
  0x30   : > { %320 = vperm.xlu0 %691, %v317_v3   ;;  %v372_v14 = vsub.f32 3.0, %v370_v10  ;;  %p740_p4 = scmp.ne.s32.totalorder %s738_s29, %s739_s17  ;;  %p744_p7 = scmp.lt.s32.totalorder %s738_s29, %s1140_s4 }
  0x31   : > { %377 = vst [vmem:[%s1010_s9 + $0x4] sm:$0xf] %v375_v17  ;;  %p745_p8 = scmp.lt.s32.totalorder %s743_s24, %s739_s17 }
  0x32   : > { %v374_v16 = vmul.f32 %v372_v14, %v368_v12  ;;  %p741_p5 = pnand %p740_p4, %p964_p9 }
  0x33   : > { %p746_p10 = por %p745_p8, %p744_p7 }
  0x34   : > { %376 = vst [vmem:[%s1010_s9] sm:$0xf] %v374_v16  ;;  %p742_p6 = pneg %p741_p5 }
  0x36   : > { %p747_p13 = pnand %p746_p10, %p742_p6 }
  0x9a   : > { %v339_v18 = vpop.permute.xlu0 %338  ;;  %v329_v30 = vpop.permute.xlu1 %328 }
  0x9b   : > { %v341_v19 = vmul.f32 %v339_v18, %v315_v4  ;;  %v342_v20 = vmul.f32 %v339_v18, %v316_v5 }
  0x9d   : > { %v344_v21 = vsel %vm343_vm0, %v341_v19, 0.0  ;;  %v351_v22 = vsel %vm343_vm0, %v342_v20, 0.0 }
  0x9e   : > { %v345_v23 = vrot.slane %v344_v21, 4  ;;  %v352_v24 = vrot.slane %v351_v22, 4 }
  0xa0   : > { %v346_v25 = vadd.f32 %v345_v23, %v344_v21  ;;  %v353_v26 = vadd.f32 %v352_v24, %v351_v22 }
  0xa2   : > { %v347_v27 = vrot.slane %v346_v25, 2  ;;  %v354_v28 = vrot.slane %v353_v26, 2  ;;  %v321_v29 = vpop.permute.xlu0 %320 }
  0xa3   : > { %v323_v31 = vsub.f32 %v315_v4, %v321_v29  ;;  %v324_v32 = vsub.f32 %v316_v5, %v321_v29 }
  0xa4   : > { %v348_v33 = vadd.f32 %v347_v27, %v346_v25  ;;  %v355_v34 = vadd.f32 %v354_v28, %v353_v26 }
  0xa5   : > { %v331_v35 = vmul.f32 %v329_v30, %v323_v31  ;;  %v332_v36 = vmul.f32 %v329_v30, %v324_v32 }
  0xa6   : > { %v349_v37 = vrot.slane %v348_v33, 1  ;;  %v356_v38 = vrot.slane %v355_v34, 1 }
  0xa7   : > { %333 = vst [vmem:[%s1018_s30] sm:$0xf] %v331_v35 }
  0xa8   : > { %v350_v39 = vadd.f32 %v349_v37, %v348_v33  ;;  %v357_v40 = vadd.f32 %v356_v38, %v355_v34  ;;  %334 = vst [vmem:[%s1018_s30 + $0x4] sm:$0xf] %v332_v36 }
  0xa9   : > { %750 = shalt.err (!%p747_p13)
}
  0xaa   : > { %s871_s16 = smov 64   ;;  %s872_s30 = smov 128   ;;  %v361_v41 = vsel %vm360_vm1, %v357_v40, %v350_v39 }
  0xab   : > { %s873_s11 = smov 4   ;;  %s1153_s0 = sshll.u32 %s1010_s9, 4  ;;  %363 = vst [vmem:[%s1033_s14] sm:$0x3] %v361_v41  ;;  %s1070_s0 = int_to_ptr.vmem [resolvable:$true] %s1153_s0 }
  0xac   : > { %614 = dma.vmem_to_hbm [thread:$0]  (%p964_p9), %s1030_s7, 128, %s1042_s28, %s379_s8, %s871_s16, %s872_s30, %s873_s11  }
  0xad   : > { %s1154_s24 = sand.u32 1, %s940_s27   ;;  %s765_s17 = sshra.s32 %s1049_s20, 4  ;;  %s766_s17 = int_to_ptr.hbm [resolvable:$true] %s765_s17 }
  0xae   : > { %s1078_s29 = scalar_lea.sflag [#allocation7], %s1154_s24  ;;  %s767_s13 = scalar_lea.hbm %s766_s17, 2 }
  0xaf   : > { %p768_p0 = scmp.ne.s32.totalorder %s766_s17, %s767_s13  ;;  %s771_s9 = scalar_lea.hbm %s1141_s5, 4 }
  0xb0   : > { %p772_p3 = scmp.lt.s32.totalorder %s766_s17, %s1141_s5  ;;  %p773_p4 = scmp.lt.s32.totalorder %s771_s9, %s767_s13 }
  0xb1   : > { %p769_p1 = pnand %p768_p0, %p964_p9 }
  0xb2   : > { %p774_p5 = por %p773_p4, %p772_p3 }
  0xb3   : > { %p770_p2 = pneg %p769_p1 }
  0xb5   : > { %p775_p6 = pnand %p774_p5, %p770_p2 }
  0xb7   : > { %778 = shalt.err (!%p775_p6)
}
  0xb8   : > { %615 = dma.vmem_to_hbm [thread:$0]  (%p964_p9), %s1047_s15, 32, %s1049_s20, %s1078_s29  }
  0xb9   : > { %s793_s27 = sshra.s32 %s1073_s19, 4  ;;  %s799_s13 = scalar_lea.hbm %s1142_s6, 16  ;;  %s794_s27 = int_to_ptr.hbm [resolvable:$true] %s793_s27 }
  0xba   : > { %s795_s14 = scalar_lea.hbm %s794_s27, 8  ;;  %p800_p13 = scmp.lt.s32.totalorder %s794_s27, %s1142_s6 }
  0xbb   : > { %p796_p7 = scmp.ne.s32.totalorder %s794_s27, %s795_s14  ;;  %p801_p0 = scmp.lt.s32.totalorder %s799_s13, %s795_s14 }
  0xbd   : > { %p797_p8 = pnand %p796_p7, %p964_p9  ;;  %p802_p1 = por %p801_p0, %p800_p13 }
  0xbf   : > { %p798_p10 = pneg %p797_p8 }
  0xc1   : > { %p803_p2 = pnand %p802_p1, %p798_p10 }
  0xc3   : > { %806 = shalt.err (!%p803_p2)
}
  0xc4   : > { %616 = dma.vmem_to_hbm [thread:$0]  (%p964_p9), %s1070_s0, 128, %s1073_s19, %s1078_s29, %s871_s16, %s872_s30, %s873_s11  }
  0xc5 PF: > { %s455_s15 = sand.u32 1, %s845_s21   ;;  %p625_p3 = pnand %p596_p12, %p973_p11 }
  0xc6   : > { %s456_s20 = scalar_lea.sflag [#allocation4], %s455_s15 }
  0xc7   : > { %p626_p4 = pneg %p625_p3 }
  0xc9   : > { %836 = dma.done.wait (%p626_p4), %s456_s20, 128  }
  0xca   : > { %838 = vsyncadd (%p626_p4), %s456_s20, 4294967168  ;;  %s1155_s10 = sadd.s32 4294967294, %s865_s26  }
  0xcb   : > { %s465_s9 = sand.u32 1, %s1155_s10  }
  0xcc   : > { %s466_s28 = scalar_lea.sflag [#allocation7], %s465_s9 }
  0xcd   : > { %840 = dma.done.wait (%p626_p4), %s466_s28, 160  }
  0xce   : > { %842 = vsyncadd (%p626_p4), %s466_s28, 4294967136  ;;  %s26_s26 = sadd.s32 1, %s865_s26   ;;  %s1156_s19 = sld [smem:[#allocation13_spill]] }
  0xcf   : > { %p23_p9 = scmp.ge.s32.totalorder %s26_s26, 4   ;;  %s1157_s12 = sld [smem:[#allocation12_spill]] }
  0xd0   : > { %s1158_s21 = smov %s849_s22  ;;  %s1159_s22 = smov %s853_s23 }
  0xd1   : > { %s1161_s24 = smov %s861_s25  ;;  %25 = sbr.rel (!%p23_p9) target bundleno = 10 (0xa), region = 113 }
  0xd4   : > { %s1160_s23 = smov %s1156_s19 }
  0xd5   : > { %s1162_s25 = smov %s1157_s12 }
  0xd6   :  { %482 = vsyncpa [#allocation3], 1 }
  0xd7   :  { %484 = vsyncpa [#allocation3 + $0x1], 1 }
  0xd8   :  { %485 = vsyncpa [#allocation4], 1 }
  0xd9   :  { %487 = vsyncpa [#allocation4 + $0x1], 1 }
  0xda   :  { %488 = vsyncpa [#allocation7], 1 }
  0xdb   :  { %490 = vsyncpa [#allocation7 + $0x1], 1 }

</bundles_post_ra>
